<compile_context>
chip_gen: v7x
topology: tpu7x:2x2x1
jax: 0.10.0
libtpu: 0.0.40
codegen_flags: <defaults>
</compile_context>

<pallas_src>
import jax
import jax.numpy as jnp
from jax.experimental import pallas as pl
from jax.experimental.pallas import tpu as pltpu

EPS = 1e-5


def _make_kernels(H, W, Hp, Wp, Lp, E, CP):
    # static row offsets of the 9 conv taps inside the E-extended flat frame
    offs = tuple(E - Wp - 1 + dh * Wp + dw for dh in range(3) for dw in range(3))

    def _interior():
        # interior-pixel predicate regenerated in-kernel (no HBM mask stream)
        r = jax.lax.broadcasted_iota(jnp.int32, (Lp, 1), 0)
        wcol = r % Wp
        hrow = r // Wp
        return (wcol >= 1) & (wcol <= W) & (hrow >= 1) & (hrow <= H)

    def _conv(a_s, w_ref):
        # single im2col matmul: (Lp, 9*CP) bf16 x (9*CP, CP) bf16 -> f32
        # lane offsets of the concat are multiples of CP=128 (lane-aligned).
        cols = jnp.concatenate([a_s[o:o + Lp, :] for o in offs], axis=1)
        return jnp.dot(cols, w_ref[...], preferred_element_type=jnp.float32)

    # ---- pass 1: BN1 sum / sum-of-squares, accumulator output + pl.when init ----
    def stats_kernel(x_ref, sums_ref):
        @pl.when(pl.program_id(0) == 0)
        def _():
            sums_ref[...] = jnp.zeros_like(sums_ref)
        x = x_ref[0]                                           # (Lp, CP) f32
        sums_ref[...] += jnp.concatenate(
            [jnp.sum(x, axis=0, keepdims=True),
             jnp.sum(x * x, axis=0, keepdims=True)], axis=0)

    # ---- pass 2: bn1 (folded) + relu + conv1 -> h, + per-image BN2 partials ----
    def conv1_kernel(x_ref, s1_ref, w1_ref, h_ref, part_ref, a_s):
        interior = _interior()
        x = x_ref[0, E:E + Lp, :]                              # (Lp, CP) f32
        a1 = jnp.maximum(x * s1_ref[0:1, :] + s1_ref[1:2, :], 0.0)
        a1 = jnp.where(interior, a1, 0.0).astype(jnp.bfloat16)
        a_s[0:E, :] = jnp.zeros((E, CP), jnp.bfloat16)         # zero edge rows
        a_s[E + Lp:, :] = jnp.zeros((E, CP), jnp.bfloat16)
        a_s[E:E + Lp, :] = a1
        h = _conv(a_s, w1_ref)                                 # (Lp, CP) f32
        hm = jnp.where(interior, h, 0.0)
        h_ref[0, 0:E, :] = jnp.zeros((E, CP), jnp.float32)
        h_ref[0, E + Lp:, :] = jnp.zeros((E, CP), jnp.float32)
        h_ref[0, E:E + Lp, :] = hm
        part_ref[0] = jnp.concatenate(
            [jnp.sum(hm, axis=0, keepdims=True),
             jnp.sum(hm * hm, axis=0, keepdims=True)], axis=0)

    # ---- pass 3: bn2 (folded) + relu + conv2 + bias + residual ----
    def conv2_kernel(h_ref, x_ref, s2_ref, w2_ref, bias2_ref, y_ref, a_s):
        interior = _interior()
        h = h_ref[0, E:E + Lp, :]
        a2 = jnp.maximum(h * s2_ref[0:1, :] + s2_ref[1:2, :], 0.0)
        a2 = jnp.where(interior, a2, 0.0).astype(jnp.bfloat16)
        a_s[0:E, :] = jnp.zeros((E, CP), jnp.bfloat16)
        a_s[E + Lp:, :] = jnp.zeros((E, CP), jnp.bfloat16)
        a_s[E:E + Lp, :] = a2
        y = _conv(a_s, w2_ref)
        # residual: x re-read here instead of being held live across both convs
        y_ref[0] = y + bias2_ref[...] + x_ref[0]

    return stats_kernel, conv1_kernel, conv2_kernel


def residual_block_pallas(x_nchw, params):
    N, C, H, W = x_nchw.shape
    Hp, Wp = H + 2, W + 2
    Lp = Hp * Wp
    CP = ((C + 127) // 128) * 128            # channels padded to full 128-lane vregs
    E = ((Wp + 1 + 7) // 8) * 8              # per-image end extension, sublane-aligned
    Le = Lp + 2 * E
    cnt = float(N * H * W)
    f32 = jnp.float32

    # --- glue: NCHW -> zero-padded NHWC per-image flat frames, channels -> CP lanes
    x_nhwc = jnp.transpose(x_nchw, (0, 2, 3, 1)).astype(f32)
    x_pad = jnp.pad(x_nhwc, ((0, 0), (1, 1), (1, 1), (0, CP - C)))
    x_body = x_pad.reshape(N, Lp, CP)
    x_ext = jnp.pad(x_body, ((0, 0), (E, E), (0, 0)))

    # --- glue: weight-norm (f32), pad to CP, OIHW -> (kh*kw*CP, CP), bf16
    def wn(v, g):
        nrm = jnp.sqrt(jnp.sum(v * v, axis=(1, 2, 3), keepdims=True))
        return v * (g[:, None, None, None] / nrm)

    def pack_w(w):
        w = jnp.pad(w, ((0, CP - C), (0, CP - C), (0, 0), (0, 0)))
        return jnp.transpose(w, (2, 3, 1, 0)).reshape(9 * CP, CP).astype(jnp.bfloat16)

    w1k = pack_w(wn(params["v1"].astype(f32), params["g1"].astype(f32)))
    w2k = pack_w(wn(params["v2"].astype(f32), params["g2"].astype(f32)))

    padc = lambda a: jnp.pad(a.astype(f32), (0, CP - C))
    g1, b1 = padc(params["gamma1"]), padc(params["beta1"])
    g2, b2 = padc(params["gamma2"]), padc(params["beta2"])
    bias2 = padc(params["bias2"]).reshape(1, CP)

    stats_kernel, conv1_kernel, conv2_kernel = _make_kernels(H, W, Hp, Wp, Lp, E, CP)

    img_ext_spec = pl.BlockSpec((1, Le, CP), lambda i: (i, 0, 0))
    img_body_spec = pl.BlockSpec((1, Lp, CP), lambda i: (i, 0, 0))
    bcast2_spec = pl.BlockSpec((2, CP), lambda i: (0, 0))
    w_spec = pl.BlockSpec((9 * CP, CP), lambda i: (0, 0))

    # ---- pass 1: BN1 stats (accumulator output, reduction axis => "arbitrary") ----
    sums1 = pl.pallas_call(
        stats_kernel,
        out_shape=jax.ShapeDtypeStruct((2, CP), f32),
        grid=(N,),
        in_specs=[img_body_spec],
        out_specs=bcast2_spec,
        compiler_params=pltpu.CompilerParams(
            dimension_semantics=("arbitrary",)),
    )(x_body)

    def fold_bn(sums, gamma, beta):
        # fold BN (batch stats, biased var) into per-channel scale/shift (host glue)
        mean = sums[0] / cnt
        var = sums[1] / cnt - mean * mean
        scale = gamma * jax.lax.rsqrt(var + EPS)
        return jnp.stack([scale, beta - mean * scale])           # (2, CP)

    s1 = fold_bn(sums1, g1, b1)

    conv_flops = 2 * N * Lp * (9 * CP) * CP
    conv_bytes = N * (2 * Le * CP * 4) + 9 * CP * CP * 2
    # per-tile working set is ~3-4 MiB (bf16 scratch + im2col slab): well under the
    # 48 MiB scoped limit and v7x's 64 MiB physical VMEM.
    conv_params = pltpu.CompilerParams(
        dimension_semantics=("parallel",),
        vmem_limit_bytes=48 * 1024 * 1024)

    # ---- pass 2: bn1+relu+conv1 -> h (+ per-image partial BN2 sums), "parallel" ----
    h_ext, part2 = pl.pallas_call(
        conv1_kernel,
        out_shape=(jax.ShapeDtypeStruct((N, Le, CP), f32),
                   jax.ShapeDtypeStruct((N, 2, CP), f32)),
        grid=(N,),
        in_specs=[img_ext_spec, bcast2_spec, w_spec],
        out_specs=(img_ext_spec, pl.BlockSpec((1, 2, CP), lambda i: (i, 0, 0))),
        scratch_shapes=[pltpu.VMEM((Le, CP), jnp.bfloat16)],
        compiler_params=conv_params,
        cost_estimate=pl.CostEstimate(flops=conv_flops, transcendentals=0,
                                      bytes_accessed=conv_bytes),
    )(x_ext, s1, w1k)

    s2 = fold_bn(jnp.sum(part2, axis=0), g2, b2)

    # ---- pass 3: bn2+relu+conv2 + bias + residual, "parallel" ----
    y_flat = pl.pallas_call(
        conv2_kernel,
        out_shape=jax.ShapeDtypeStruct((N, Lp, CP), f32),
        grid=(N,),
        in_specs=[img_ext_spec, img_body_spec, bcast2_spec, w_spec,
                  pl.BlockSpec((1, CP), lambda i: (0, 0))],
        out_specs=img_body_spec,
        scratch_shapes=[pltpu.VMEM((Le, CP), jnp.bfloat16)],
        compiler_params=conv_params,
        cost_estimate=pl.CostEstimate(flops=conv_flops, transcendentals=0,
                                      bytes_accessed=conv_bytes),
    )(h_ext, x_body, s2, w2k, bias2)

    # --- glue: flat padded NHWC (CP lanes) -> NCHW, drop pad ring + padded channels
    y = y_flat.reshape(N, Hp, Wp, CP)[:, 1:H + 1, 1:W + 1, :C]
    return jnp.transpose(y, (0, 3, 1, 2))


def residual_block_ref(x, p):
    """Pure-JAX f32 reference mirroring the PyTorch module (training-mode BN)."""
    def bn(t, g, b):
        mean = jnp.mean(t, axis=(0, 2, 3), keepdims=True)
        var = jnp.mean((t - mean) ** 2, axis=(0, 2, 3), keepdims=True)
        return ((t - mean) * jax.lax.rsqrt(var + EPS)
                * g[None, :, None, None] + b[None, :, None, None])

    def wn(v, g):
        nrm = jnp.sqrt(jnp.sum(v * v, axis=(1, 2, 3), keepdims=True))
        return v * (g[:, None, None, None] / nrm)

    def conv(t, w, bias=None):
        y = jax.lax.conv_general_dilated(
            t, w, window_strides=(1, 1), padding=((1, 1), (1, 1)),
            dimension_numbers=("NCHW", "OIHW", "NCHW"),
            precision=jax.lax.Precision.HIGHEST)
        if bias is not None:
            y = y + bias[None, :, None, None]
        return y

    skip = x
    h = conv(jnp.maximum(bn(x, p["gamma1"], p["beta1"]), 0.0),
             wn(p["v1"], p["g1"]))
    y = conv(jnp.maximum(bn(h, p["gamma2"], p["beta2"]), 0.0),
             wn(p["v2"], p["g2"]), p["bias2"])
    return y + skip


if __name__ == "__main__":
    key = jax.random.PRNGKey(0)
    N, C, H, W = 2, 4, 16, 16          # in_channels == out_channels (residual add)
    keys = jax.random.split(key, 10)
    x = jax.random.normal(keys[0], (N, C, H, W), jnp.float32)
    params = {
        "gamma1": 1.0 + 0.1 * jax.random.normal(keys[1], (C,), jnp.float32),
        "beta1": 0.1 * jax.random.normal(keys[2], (C,), jnp.float32),
        "v1": 0.3 * jax.random.normal(keys[3], (C, C, 3, 3), jnp.float32),
        "g1": 0.5 + jnp.abs(jax.random.normal(keys[4], (C,), jnp.float32)),
        "gamma2": 1.0 + 0.1 * jax.random.normal(keys[5], (C,), jnp.float32),
        "beta2": 0.1 * jax.random.normal(keys[6], (C,), jnp.float32),
        "v2": 0.3 * jax.random.normal(keys[7], (C, C, 3, 3), jnp.float32),
        "g2": 0.5 + jnp.abs(jax.random.normal(keys[8], (C,), jnp.float32)),
        "bias2": 0.1 * jax.random.normal(keys[9], (C,), jnp.float32),
    }

    out = jax.block_until_ready(residual_block_pallas(x, params))
    ref = residual_block_ref(x, params)
    assert out.shape == ref.shape == (N, C, H, W)
    # bf16 MXU matmuls with f32 accumulation vs the exact-f32 reference give
    # ~3e-2 max abs error at these magnitudes; tolerances sized accordingly.
    max_err = float(jnp.max(jnp.abs(out - ref)))
    mean_err = float(jnp.mean(jnp.abs(out - ref)))
    assert max_err < 1e-1, f"max abs error {max_err}"
    assert mean_err < 1e-2, f"mean abs error {mean_err}"
    print("KERNEL_OK")
</pallas_src>

<mosaic_0001>
module attributes {stable_mosaic.version = 11 : i64} {
  func.func @stats_kernel(%arg0: i32, %arg1: memref<1x324x128xf32, #tpu.memory_space<vmem>>, %arg2: memref<2x128xf32, #tpu.memory_space<vmem>>) attributes {dimension_semantics = [#tpu.dimension_semantics<arbitrary>], iteration_bounds = array<i64: 2>, scalar_prefetch = 0 : i64, scratch_operands = 0 : i64, tpu.core_type = #tpu.core_type<tc>, window_params = [{transform_indices = @transform_0, window_bounds = array<i64: 1, 324, 128>}, {pipeline_mode = #tpu.pipeline_mode<synchronous>, transform_indices = @transform_1, window_bounds = array<i64: 2, 128>}]} {
    %c0_i32 = arith.constant 0 : i32
    %0 = arith.cmpi eq, %arg0, %c0_i32 : i32
    %1 = arith.extui %0 : i1 to i32
    %c0_i32_0 = arith.constant 0 : i32
    %2 = arith.cmpi ne, %1, %c0_i32_0 : i32
    scf.if %2 {
      %cst_8 = arith.constant 0.000000e+00 : f32
      %14 = vector.broadcast %cst_8 : f32 to vector<2x128xf32>
      %c0_9 = arith.constant 0 : index
      %c0_10 = arith.constant 0 : index
      %15 = vector.load %arg2[%c0_9, %c0_10] : memref<2x128xf32, #tpu.memory_space<vmem>>, vector<2x128xf32>
      tpu.vector_store %arg2[%c0_9, %c0_10], %14 {strides = array<i32>} : memref<2x128xf32, #tpu.memory_space<vmem>>, vector<2x128xf32>,
    } else {
    }
    %c0 = arith.constant 0 : index
    %c0_1 = arith.constant 0 : index
    %c0_2 = arith.constant 0 : index
    %3 = vector.load %arg1[%c0, %c0_1, %c0_2] : memref<1x324x128xf32, #tpu.memory_space<vmem>>, vector<1x324x128xf32>
    %4 = vector.shape_cast %3 : vector<1x324x128xf32> to vector<324x128xf32>
    %c0_3 = arith.constant 0 : index
    %c0_4 = arith.constant 0 : index
    %5 = vector.load %arg2[%c0_3, %c0_4] : memref<2x128xf32, #tpu.memory_space<vmem>>, vector<2x128xf32>
    %cst = arith.constant dense<0.000000e+00> : vector<128xf32>
    %6 = vector.multi_reduction <add>, %4, %cst [0] : vector<324x128xf32> to vector<128xf32>
    %7 = vector.shape_cast %6 : vector<128xf32> to vector<1x128xf32>
    %8 = arith.mulf %4, %4 : vector<324x128xf32>
    %cst_5 = arith.constant dense<0.000000e+00> : vector<128xf32>
    %9 = vector.multi_reduction <add>, %8, %cst_5 [0] : vector<324x128xf32> to vector<128xf32>
    %10 = vector.shape_cast %9 : vector<128xf32> to vector<1x128xf32>
    %11 = tpu.concatenate %7, %10 in 0 : vector<1x128xf32>, vector<1x128xf32> -> vector<2x128xf32>
    %12 = arith.addf %5, %11 : vector<2x128xf32>
    %c0_6 = arith.constant 0 : index
    %c0_7 = arith.constant 0 : index
    %13 = vector.load %arg2[%c0_6, %c0_7] : memref<2x128xf32, #tpu.memory_space<vmem>>, vector<2x128xf32>
    tpu.vector_store %arg2[%c0_6, %c0_7], %12 {strides = array<i32>} : memref<2x128xf32, #tpu.memory_space<vmem>>, vector<2x128xf32>,
    return
  }
  func.func @transform_0(%arg0: i32) -> (i32, i32, i32) {
    %c0_i32 = arith.constant 0 : i32
    %c0_i32_0 = arith.constant 0 : i32
    %c0_i32_1 = arith.constant 0 : i32
    return %arg0, %c0_i32, %c0_i32_0 : i32, i32, i32
  }
  func.func @transform_1(%arg0: i32) -> (i32, i32) {
    %c0_i32 = arith.constant 0 : i32
    %c0_i32_0 = arith.constant 0 : i32
    %c0_i32_1 = arith.constant 0 : i32
    return %c0_i32, %c0_i32_0 : i32, i32
  }
}

</mosaic_0001>

<bundles_post_ra>
// kernel: tpu_custom_call.1
= control target key start
LH: loop header
LB: loop body
LE: loop exit
PB: predicated region body
PF: predicated region fallthrough
CT: control target
= control target key end

     0   :  { %6 = vsyncpa [#allocation3], 0  ;;  %s413_s6 = smov 0   ;;  %s498_s0 = inlined_call_operand.vmem [shape: f32[2,324,128], index: 0, kind: input, shape index: {}]   ;;  %s499_s1 = inlined_call_operand.hbm [shape: f32[2,128], index: 1, kind: output, shape index: {}]  }
   0x1 LB: > { %s419_s7 = sadd.s32 4294967295, %s399_s6   ;;  %p339_p0 = scmp.ge.s32.totalorder %s399_s6, 1  ;;  %s399_s6 = sphi %s413_s6, %s12_s6  }
   0x2   : > { %p83_p1 = scmp.lt.s32.totalorder %s399_s6, 3 }
   0x4   : > { %p84_p2 = pnand %p339_p0, %p83_p1 }
   0x5   : > { %p98_p3 = scmp.lt.s32.totalorder (!%p84_p2), %s419_s7, 1  ;;  %p341_p4 = scmp.ne.s32.totalorder (!%p84_p2), %s419_s7, 0 }
   0x6   : > { %87 = sbr.rel (%p84_p2) target bundleno = 134 (0x86), region = 24 }
   0xd   : > { %s99_s8 = scalar_select %p98_p3, %s419_s7, 1 }
   0xe   : > { %106 = sbr.rel (%p341_p4) target bundleno = 21 (0x15), region = 28  ;;  %v401_v0 = vmov (!%p341_p4), 0.0  }
   0xf   : > { %s346_s9 = smul.u32 328, %s99_s8  ;;  %107 = vst [vmem:[#allocation2] sm:$0x3] (!%p341_p4), %v401_v0 }
  0x11   : > { %s428_s12 = scalar_lea.vmem %s498_s0, %s346_s9 }
  0x15 PF: > { %v108_v1 = vld [vmem:[%s428_s12] sm:$0xff]  ;;  %v109_v2 = vld [vmem:[%s428_s12 + $0x8] sm:$0xff]  ;;  %v110_v3 = vld [vmem:[%s428_s12 + $0x10] sm:$0xff]  ;;  %vm189_vm0 = vcmask 1043456   ;;  %vm286_vm1 = vcmask 1040384   ;;  %s402_s13 = smov [#allocation2]  }
  0x16   : > { %v111_v4 = vld [vmem:[%s428_s12 + $0x18] sm:$0xff]  ;;  %v150_v5 = vadd.f32 %v109_v2, %v108_v1  ;;  %v198_v6 = vmul.f32 %v108_v1, %v108_v1  ;;  %v199_v7 = vmul.f32 %v109_v2, %v109_v2  ;;  %v200_v8 = vmul.f32 %v110_v3, %v110_v3  ;;  %v112_v9 = vld [vmem:[%s428_s12 + $0x20] sm:$0xff]  ;;  %v113_v13 = vld [vmem:[%s428_s12 + $0x28] sm:$0xff]  ;;  %s297_s14 = sshll.u32 %s402_s13, 4  ;;  %p351_p5 = scmp.eq.s32.totalorder %s419_s7, 1  ;;  %s298_s14 = int_to_ptr.vmem [resolvable:$true] %s297_s14 }
  0x17   : > { %v201_v11 = vmul.f32 %v111_v4, %v111_v4  ;;  %v202_v15 = vmul.f32 %v112_v9, %v112_v9  ;;  %v114_v17 = vld [vmem:[%s428_s12 + $0x30] sm:$0xff]  ;;  %v203_v19 = vmul.f32 %v113_v13, %v113_v13  ;;  %v115_v21 = vld [vmem:[%s428_s12 + $0x38] sm:$0xff]  ;;  %v116_v25 = vld [vmem:[%s428_s12 + $0x40] sm:$0xff]  ;;  %s363_s15 = scalar_lea.vmem %s298_s14, 32  ;;  %p370_p9 = scmp.lt.s32.totalorder %s298_s14, %s298_s14 }
  0x18   : > { %v151_v10 = vadd.f32 %v150_v5, %v110_v3  ;;  %v239_v12 = vadd.f32 %v199_v7, %v198_v6  ;;  %v204_v23 = vmul.f32 %v114_v17, %v114_v17  ;;  %v205_v27 = vmul.f32 %v115_v21, %v115_v21  ;;  %v117_v29 = vld [vmem:[%s428_s12 + $0x48] sm:$0xff]  ;;  %v118_v33 = vld [vmem:[%s428_s12 + $0x50] sm:$0xff]  ;;  %v119_v37 = vld [vmem:[%s428_s12 + $0x58] sm:$0xff]  ;;  %p364_p6 = scmp.ne.s32.totalorder %s298_s14, %s363_s15  ;;  %p371_p10 = scmp.lt.s32.totalorder %s363_s15, %s363_s15 }
  0x19   : > { %v206_v31 = vmul.f32 %v116_v25, %v116_v25  ;;  %v207_v35 = vmul.f32 %v117_v29, %v117_v29  ;;  %v208_v39 = vmul.f32 %v118_v33, %v118_v33  ;;  %v120_v41 = vld [vmem:[%s428_s12 + $0x60] sm:$0xff]  ;;  %v209_v43 = vmul.f32 %v119_v37, %v119_v37  ;;  %v121_v45 = vld [vmem:[%s428_s12 + $0x68] sm:$0xff]  ;;  %v122_v49 = vld [vmem:[%s428_s12 + $0x70] sm:$0xff] }
  0x1a   : > { %v152_v14 = vadd.f32 %v151_v10, %v111_v4  ;;  %v240_v16 = vadd.f32 %v239_v12, %v200_v8  ;;  %v210_v47 = vmul.f32 %v120_v41, %v120_v41  ;;  %v211_v51 = vmul.f32 %v121_v45, %v121_v45  ;;  %v123_v53 = vld [vmem:[%s428_s12 + $0x78] sm:$0xff]  ;;  %v124_v57 = vld [vmem:[%s428_s12 + $0x80] sm:$0xff]  ;;  %v125_v61 = vld [vmem:[%s428_s12 + $0x88] sm:$0xff]  ;;  %p365_p7 = pnand %p364_p6, %p351_p5  ;;  %p372_p11 = por %p371_p10, %p370_p9 }
  0x1b   : > { %v212_v55 = vmul.f32 %v122_v49, %v122_v49  ;;  %v213_v59 = vmul.f32 %v123_v53, %v123_v53  ;;  %v214_v63 = vmul.f32 %v124_v57, %v124_v57  ;;  %v126_v1 = vld [vmem:[%s428_s12 + $0x90] sm:$0xff]  ;;  %v215_v3 = vmul.f32 %v125_v61, %v125_v61  ;;  %v127_v5 = vld [vmem:[%s428_s12 + $0x98] sm:$0xff] }
  0x1c   : > { %v153_v18 = vadd.f32 %v152_v14, %v112_v9  ;;  %v241_v20 = vadd.f32 %v240_v16, %v201_v11  ;;  %v216_v7 = vmul.f32 %v126_v1, %v126_v1  ;;  %v128_v9 = vld [vmem:[%s428_s12 + $0xa0] sm:$0xff]  ;;  %v217_v11 = vmul.f32 %v127_v5, %v127_v5  ;;  %p366_p8 = pneg %p365_p7 }
  0x1e   : > { %v154_v22 = vadd.f32 %v153_v18, %v113_v13  ;;  %v242_v24 = vadd.f32 %v241_v20, %v202_v15  ;;  %v129_v13 = vld [vmem:[%s428_s12 + $0xa8] sm:$0xff]  ;;  %v218_v15 = vmul.f32 %v128_v9, %v128_v9  ;;  %p373_p12 = pnand %p372_p11, %p366_p8 }
  0x20   : > { %v155_v26 = vadd.f32 %v154_v22, %v114_v17  ;;  %v243_v28 = vadd.f32 %v242_v24, %v203_v19  ;;  %v130_v17 = vld [vmem:[%s428_s12 + $0xb0] sm:$0xff]  ;;  %v219_v19 = vmul.f32 %v129_v13, %v129_v13 }
  0x22   : > { %v156_v30 = vadd.f32 %v155_v26, %v115_v21  ;;  %v244_v32 = vadd.f32 %v243_v28, %v204_v23  ;;  %v131_v21 = vld [vmem:[%s428_s12 + $0xb8] sm:$0xff]  ;;  %v220_v23 = vmul.f32 %v130_v17, %v130_v17 }
  0x24   : > { %v157_v34 = vadd.f32 %v156_v30, %v116_v25  ;;  %v245_v36 = vadd.f32 %v244_v32, %v205_v27  ;;  %v132_v25 = vld [vmem:[%s428_s12 + $0xc0] sm:$0xff]  ;;  %v221_v27 = vmul.f32 %v131_v21, %v131_v21 }
  0x26   : > { %v158_v38 = vadd.f32 %v157_v34, %v117_v29  ;;  %v246_v40 = vadd.f32 %v245_v36, %v206_v31  ;;  %v133_v29 = vld [vmem:[%s428_s12 + $0xc8] sm:$0xff]  ;;  %v222_v31 = vmul.f32 %v132_v25, %v132_v25 }
  0x28   : > { %v159_v42 = vadd.f32 %v158_v38, %v118_v33  ;;  %v247_v44 = vadd.f32 %v246_v40, %v207_v35  ;;  %v134_v33 = vld [vmem:[%s428_s12 + $0xd0] sm:$0xff]  ;;  %v223_v35 = vmul.f32 %v133_v29, %v133_v29 }
  0x2a   : > { %v160_v46 = vadd.f32 %v159_v42, %v119_v37  ;;  %v248_v48 = vadd.f32 %v247_v44, %v208_v39  ;;  %v135_v37 = vld [vmem:[%s428_s12 + $0xd8] sm:$0xff]  ;;  %v224_v39 = vmul.f32 %v134_v33, %v134_v33 }
  0x2c   : > { %v161_v50 = vadd.f32 %v160_v46, %v120_v41  ;;  %v249_v52 = vadd.f32 %v248_v48, %v209_v43  ;;  %v136_v41 = vld [vmem:[%s428_s12 + $0xe0] sm:$0xff]  ;;  %v225_v43 = vmul.f32 %v135_v37, %v135_v37 }
  0x2e   : > { %v162_v54 = vadd.f32 %v161_v50, %v121_v45  ;;  %v250_v56 = vadd.f32 %v249_v52, %v210_v47  ;;  %v137_v45 = vld [vmem:[%s428_s12 + $0xe8] sm:$0xff]  ;;  %v226_v47 = vmul.f32 %v136_v41, %v136_v41 }
  0x30   : > { %v163_v58 = vadd.f32 %v162_v54, %v122_v49  ;;  %v251_v60 = vadd.f32 %v250_v56, %v211_v51  ;;  %v138_v49 = vld [vmem:[%s428_s12 + $0xf0] sm:$0xff]  ;;  %v227_v51 = vmul.f32 %v137_v45, %v137_v45 }
  0x32   : > { %v164_v62 = vadd.f32 %v163_v58, %v123_v53  ;;  %v252_v0 = vadd.f32 %v251_v60, %v212_v55  ;;  %v139_v53 = vld [vmem:[%s428_s12 + $0xf8] sm:$0xff]  ;;  %v228_v55 = vmul.f32 %v138_v49, %v138_v49 }
  0x34   : > { %v165_v2 = vadd.f32 %v164_v62, %v124_v57  ;;  %v253_v4 = vadd.f32 %v252_v0, %v213_v59  ;;  %v140_v57 = vld [vmem:[%s428_s12 + $0x100] sm:$0xff]  ;;  %v229_v59 = vmul.f32 %v139_v53, %v139_v53 }
  0x36   : > { %v166_v6 = vadd.f32 %v165_v2, %v125_v61  ;;  %v254_v8 = vadd.f32 %v253_v4, %v214_v63  ;;  %v141_v61 = vld [vmem:[%s428_s12 + $0x108] sm:$0xff]  ;;  %v230_v63 = vmul.f32 %v140_v57, %v140_v57 }
  0x38   : > { %v167_v10 = vadd.f32 %v166_v6, %v126_v1  ;;  %v255_v12 = vadd.f32 %v254_v8, %v215_v3  ;;  %v142_v1 = vld [vmem:[%s428_s12 + $0x110] sm:$0xff]  ;;  %v231_v3 = vmul.f32 %v141_v61, %v141_v61 }
  0x3a   : > { %v168_v14 = vadd.f32 %v167_v10, %v127_v5  ;;  %v256_v16 = vadd.f32 %v255_v12, %v216_v7  ;;  %v143_v5 = vld [vmem:[%s428_s12 + $0x118] sm:$0xff]  ;;  %v232_v7 = vmul.f32 %v142_v1, %v142_v1 }
  0x3c   : > { %v169_v18 = vadd.f32 %v168_v14, %v128_v9  ;;  %v257_v20 = vadd.f32 %v256_v16, %v217_v11  ;;  %v144_v9 = vld [vmem:[%s428_s12 + $0x120] sm:$0xff]  ;;  %v233_v11 = vmul.f32 %v143_v5, %v143_v5 }
  0x3e   : > { %v170_v22 = vadd.f32 %v169_v18, %v129_v13  ;;  %v258_v24 = vadd.f32 %v257_v20, %v218_v15  ;;  %v145_v13 = vld [vmem:[%s428_s12 + $0x128] sm:$0xff]  ;;  %v234_v15 = vmul.f32 %v144_v9, %v144_v9 }
  0x3f   : > { %v235_v20 = vmul.f32 %v145_v13, %v145_v13 }
  0x40   : > { %v171_v26 = vadd.f32 %v170_v22, %v130_v17  ;;  %v259_v28 = vadd.f32 %v258_v24, %v219_v19  ;;  %v146_v17 = vld [vmem:[%s428_s12 + $0x130] sm:$0xff]  ;;  %v148_v19 = vld [vmem:[%s428_s12 + $0x140] sm:$0xf]  ;;  %v147_v22 = vld [vmem:[%s428_s12 + $0x138] sm:$0xff] }
  0x41   : > { %v236_v24 = vmul.f32 %v146_v17, %v146_v17 }
  0x42   : > { %v172_v30 = vadd.f32 %v171_v26, %v131_v21  ;;  %v260_v32 = vadd.f32 %v259_v28, %v220_v23  ;;  %v190_v28 = vsel %vm189_vm0, %v148_v19, 0.0 }
  0x44   : > { %v173_v34 = vadd.f32 %v172_v30, %v132_v25  ;;  %v261_v36 = vadd.f32 %v260_v32, %v221_v27  ;;  %v238_v27 = vmul.f32 %v148_v19, %v148_v19 }
  0x46   : > { %v174_v38 = vadd.f32 %v173_v34, %v133_v29  ;;  %v262_v40 = vadd.f32 %v261_v36, %v222_v31  ;;  %v237_v29 = vmul.f32 %v147_v22, %v147_v22  ;;  %v278_v34 = vsel %vm189_vm0, %v238_v27, 0.0 }
  0x48   : > { %v175_v42 = vadd.f32 %v174_v38, %v134_v33  ;;  %v263_v44 = vadd.f32 %v262_v40, %v223_v35 }
  0x4a   : > { %v176_v46 = vadd.f32 %v175_v42, %v135_v37  ;;  %v264_v48 = vadd.f32 %v263_v44, %v224_v39 }
  0x4c   : > { %v177_v50 = vadd.f32 %v176_v46, %v136_v41  ;;  %v265_v52 = vadd.f32 %v264_v48, %v225_v43  ;;  %v149_v48 = vld [vmem:[#allocation2] sm:$0x3] }
  0x4e   : > { %v178_v54 = vadd.f32 %v177_v50, %v137_v45  ;;  %v266_v56 = vadd.f32 %v265_v52, %v226_v47 }
  0x50   : > { %v179_v58 = vadd.f32 %v178_v54, %v138_v49  ;;  %v267_v60 = vadd.f32 %v266_v56, %v227_v51 }
  0x52   : > { %v180_v62 = vadd.f32 %v179_v58, %v139_v53  ;;  %v268_v0 = vadd.f32 %v267_v60, %v228_v55 }
  0x54   : > { %v181_v2 = vadd.f32 %v180_v62, %v140_v57  ;;  %v269_v4 = vadd.f32 %v268_v0, %v229_v59 }
  0x56   : > { %v182_v6 = vadd.f32 %v181_v2, %v141_v61  ;;  %v270_v8 = vadd.f32 %v269_v4, %v230_v63 }
  0x58   : > { %v183_v10 = vadd.f32 %v182_v6, %v142_v1  ;;  %v271_v12 = vadd.f32 %v270_v8, %v231_v3 }
  0x5a   : > { %v184_v14 = vadd.f32 %v183_v10, %v143_v5  ;;  %v272_v16 = vadd.f32 %v271_v12, %v232_v7 }
  0x5c   : > { %v185_v18 = vadd.f32 %v184_v14, %v144_v9  ;;  %v273_v21 = vadd.f32 %v272_v16, %v233_v11 }
  0x5e   : > { %v186_v23 = vadd.f32 %v185_v18, %v145_v13  ;;  %v274_v25 = vadd.f32 %v273_v21, %v234_v15 }
  0x60   : > { %v187_v26 = vadd.f32 %v186_v23, %v146_v17  ;;  %v275_v30 = vadd.f32 %v274_v25, %v235_v20 }
  0x62   : > { %v188_v31 = vadd.f32 %v187_v26, %v147_v22  ;;  %v276_v32 = vadd.f32 %v275_v30, %v236_v24 }
  0x64   : > { %v191_v33 = vadd.f32 %v190_v28, %v188_v31  ;;  %v277_v35 = vadd.f32 %v276_v32, %v237_v29 }
  0x66   : > { %v192_v36 = vrot.slane %v191_v33, 4  ;;  %v279_v37 = vadd.f32 %v278_v34, %v277_v35 }
  0x68   : > { %v193_v38 = vadd.f32 %v192_v36, %v191_v33  ;;  %v280_v39 = vrot.slane %v279_v37, 4 }
  0x6a   : > { %v194_v40 = vrot.slane %v193_v38, 2  ;;  %v281_v41 = vadd.f32 %v280_v39, %v279_v37 }
  0x6c   : > { %v195_v42 = vadd.f32 %v194_v40, %v193_v38  ;;  %v282_v43 = vrot.slane %v281_v41, 2 }
  0x6e   : > { %v196_v44 = vrot.slane %v195_v42, 1  ;;  %v283_v45 = vadd.f32 %v282_v43, %v281_v41 }
  0x70   : > { %v197_v46 = vadd.f32 %v196_v44, %v195_v42  ;;  %v284_v47 = vrot.slane %v283_v45, 1 }
  0x72   : > { %v285_v49 = vadd.f32 %v284_v47, %v283_v45 }
  0x74   : > { %v287_v50 = vsel %vm286_vm1, %v197_v46, %v285_v49 }
  0x75   : > { %v288_v51 = vadd.f32 %v287_v50, %v149_v48 }
  0x77   : > { %289 = vst [vmem:[#allocation2] sm:$0x3] %v288_v51 }
  0x78   : > { %376 = shalt.err (!%p373_p12)
}
  0x79   : > { %s377_s18 = scalar_lea.hbm %s499_s1, 32 }
  0x7a   : > { %p378_p13 = scmp.ne.s32.totalorder %s499_s1, %s377_s18  ;;  %p383_p2 = scmp.lt.u32.totalorder %s377_s18, %s499_s1 }
  0x7c   : > { %p379_p0 = pnand %p378_p13, %p351_p5 }
  0x7e   : > { %p380_p1 = pneg %p379_p0 }
  0x80   : > { %p385_p3 = pnand %p383_p2, %p380_p1 }
  0x82   : > { %388 = shalt.err (!%p385_p3)
}
  0x83   : > { %348 = dma.vmem_to_hbm [thread:$0]  (%p351_p5), %s298_s14, 32, %s499_s1, [#allocation3]  }
  0x84   : > { %394 = dma.done.wait (%p351_p5), [#allocation3], 32  }
  0x85   : > { %396 = vsyncadd (%p351_p5), [#allocation3], 4294967264 }
  0x86 PF: > { %s12_s6 = sadd.s32 1, %s399_s6  }
  0x87   : > { %p9_p4 = scmp.ge.s32.totalorder %s12_s6, 4  }
  0x89   :  { %11 = sbr.rel (!%p9_p4) target bundleno = 1 (0x1), region = 55 }
  0x90   :  { %310 = vsyncpa [#allocation3], 1 }
  0x91   :  { %312 = vsyncpa [#allocation3 + $0x1], 1 }

</bundles_post_ra>
